<compile_context>
chip_gen: v7x
topology: tpu7x:2x2x1
jax: 0.10.0
libtpu: 0.0.40
codegen_flags: <defaults>
</compile_context>

<pallas_src>
import functools

import jax
import jax.numpy as jnp
from jax.experimental import pallas as pl
from jax.experimental.pallas import tpu as pltpu


def _round_up(x: int, m: int) -> int:
    return ((x + m - 1) // m) * m


def _default_vmem_budget_bytes() -> int:
    """~75% of physical VMEM (v7x: 64 MiB -> 48 MiB; v5e/v6e: 128 MiB -> 96 MiB)."""
    cap = None
    try:
        cap = getattr(pltpu.get_tpu_info(), "vmem_capacity_bytes", None)
    except Exception:
        cap = None
    if not cap:
        cap = 64 * 1024 * 1024  # conservative fallback (v7x physical)
    return int(0.75 * cap)


# --------------------------------------------------------------------------- #
# Kernels
# --------------------------------------------------------------------------- #

def _text_projection_kernel(f_ref, w1_ref, b1_ref, w2_ref, b2_ref, o_ref,
                            *, one_minus_alpha: float):
    """Resident-weights path: one batch tile per grid step, full W1/W2 in VMEM."""
    # linear1: bf16 MXU operands, f32 accumulate; bias + ReLU in f32 on the VPU.
    h = jnp.dot(f_ref[...].astype(jnp.bfloat16), w1_ref[...],
                preferred_element_type=jnp.float32)
    h = jnp.maximum(h + b1_ref[...], 0.0)

    # linear2 (alpha already folded into w2/b2 by the wrapper).
    av = jnp.dot(h.astype(jnp.bfloat16), w2_ref[...],
                 preferred_element_type=jnp.float32) + b2_ref[...]

    # Residual mix: re-read f here so no f32 copy is live across both matmuls.
    o_ref[...] = (av + one_minus_alpha * f_ref[...].astype(jnp.float32)
                  ).astype(o_ref.dtype)


def _text_projection_kernel_ktiled(f_ref, w1_ref, b1_ref, w2_ref, b2_ref, o_ref,
                                   acc_ref, *, one_minus_alpha: float):
    """Fallback path: intermediate dim tiled, f32 accumulator across k steps."""
    k = pl.program_id(1)

    @pl.when(k == 0)
    def _():
        acc_ref[...] = jnp.zeros_like(acc_ref)

    # ReLU is elementwise per intermediate column, so chunking I is exact.
    h = jnp.dot(f_ref[...].astype(jnp.bfloat16), w1_ref[...],
                preferred_element_type=jnp.float32)
    h = jnp.maximum(h + b1_ref[...], 0.0)
    acc_ref[...] += jnp.dot(h.astype(jnp.bfloat16), w2_ref[...],
                            preferred_element_type=jnp.float32)

    @pl.when(k == pl.num_programs(1) - 1)
    def _():
        av = acc_ref[...] + b2_ref[...]
        o_ref[...] = (av + one_minus_alpha * f_ref[...].astype(jnp.float32)
                      ).astype(o_ref.dtype)


# --------------------------------------------------------------------------- #
# Wrapper
# --------------------------------------------------------------------------- #

def _pick_batch_tile(B, avail_bytes, per_row_bytes, block_b):
    if block_b is not None:
        tb = max(8, (int(block_b) // 8) * 8)
    else:
        tb = int(avail_bytes // per_row_bytes)
        tb = max(8, min(4096, (tb // 8) * 8))
        # Keep >= 2 grid steps when the batch permits: shards the parallel
        # batch axis across v7x's 2 TensorCores and keeps DMA/compute overlap.
        if B > 16:
            tb = min(tb, max(8, _round_up(pl.cdiv(B, 2), 8)))
    return min(tb, _round_up(B, 8))


def text_projection_layer(f, w1, b1, w2, b2, alpha=0.8, *,
                          block_b=None, block_i=None,
                          vmem_budget_bytes=None, force_k_tiling=False):
    """
    f  : (B, feature_dim)
    w1 : (feature_dim, intermediate_dim)   -- already transposed to (in, out)
    b1 : (intermediate_dim,)
    w2 : (intermediate_dim, feature_dim)
    b2 : (feature_dim,)
    alpha must be a static Python scalar (it is folded at trace time).
    """
    B, F = f.shape
    I = w1.shape[1]
    out_dtype = f.dtype
    itemsize = jnp.dtype(out_dtype).itemsize

    if vmem_budget_bytes is None:
        vmem_budget_bytes = _default_vmem_budget_bytes()
    vmem_budget_bytes = int(vmem_budget_bytes)

    alpha = float(alpha)                       # static scalar only (see docstring)
    one_minus_alpha = float(1.0 - alpha)

    # --- pad feature dims to lane-dense multiples of 128 -------------------
    F_pad = _round_up(F, 128)
    I_pad = _round_up(I, 128)

    # Zero padding preserves the math: padded input cols are 0, padded weight
    # rows/cols are 0, padded bias entries are 0 -> padded output cols are 0
    # and are sliced off below.  alpha is folded into W2/b2 here (one-time
    # wrapper cost, amortized over every batch tile).
    w1p = jnp.zeros((F_pad, I_pad), jnp.bfloat16).at[:F, :I].set(
        w1.astype(jnp.bfloat16))
    w2p = jnp.zeros((I_pad, F_pad), jnp.bfloat16).at[:I, :F].set(
        (alpha * w2).astype(jnp.bfloat16))
    b1p = jnp.zeros((1, I_pad), jnp.float32).at[0, :I].set(b1.astype(jnp.float32))
    b2p = jnp.zeros((1, F_pad), jnp.float32).at[0, :F].set(
        alpha * b2.astype(jnp.float32))

    compiler_params = dict(vmem_limit_bytes=vmem_budget_bytes)

    # --- resident-weights path sizing ---------------------------------------
    # Single pipeline buffer for the constant-index weights/biases.
    resident_bytes = 2 * 2 * F_pad * I_pad          # W1 + W2 (bf16, 1 buffer each)
    resident_bytes += 4 * (I_pad + F_pad)           # b1 + b2 (f32, 1 buffer each)

    per_row_bytes = (
        2 * 2 * itemsize * F_pad                    # streamed f + out tiles (x2 buffers)
        + 2 * F_pad                                 # bf16 cast of f (MXU operand)
        + 6 * I_pad                                 # f32 h + bf16 cast of h
        + 8 * F_pad                                 # f32 av + f32 residual re-read
    )
    per_row_bytes = int(per_row_bytes * 1.15)       # headroom for scheduling temps

    avail = vmem_budget_bytes - resident_bytes
    use_k_tiling = force_k_tiling or (avail < 8 * per_row_bytes)

    if not use_k_tiling:
        tb = _pick_batch_tile(B, avail, per_row_bytes, block_b)
        B_pad = _round_up(B, tb)
        f_p = jnp.zeros((B_pad, F_pad), out_dtype).at[:B, :F].set(f)

        kernel = functools.partial(_text_projection_kernel,
                                   one_minus_alpha=one_minus_alpha)
        resident = pl.Buffered(1)   # constant index_map -> single buffer suffices

        out_p = pl.pallas_call(
            kernel,
            out_shape=jax.ShapeDtypeStruct((B_pad, F_pad), out_dtype),
            grid=(B_pad // tb,),
            in_specs=[
                pl.BlockSpec((tb, F_pad), lambda i: (i, 0)),                       # f (streams)
                pl.BlockSpec((F_pad, I_pad), lambda i: (0, 0), pipeline_mode=resident),  # W1
                pl.BlockSpec((1, I_pad), lambda i: (0, 0), pipeline_mode=resident),      # b1
                pl.BlockSpec((I_pad, F_pad), lambda i: (0, 0), pipeline_mode=resident),  # W2
                pl.BlockSpec((1, F_pad), lambda i: (0, 0), pipeline_mode=resident),      # b2
            ],
            out_specs=pl.BlockSpec((tb, F_pad), lambda i: (i, 0)),
            compiler_params=pltpu.CompilerParams(
                dimension_semantics=("parallel",), **compiler_params),
        )(f_p, w1p, b1p, w2p, b2p)
        return out_p[:B, :F]

    # --- fallback: tile the intermediate dim (weights too big to be resident)
    tI = min(I_pad, 512 if block_i is None else max(128, _round_up(int(block_i), 128)))
    while I_pad % tI != 0:     # keep exact chunking (I_pad is a multiple of 128)
        tI -= 128

    resident_k = 2 * (2 * 2 * F_pad * tI)           # W1/W2 chunks, bf16, double-buffered
    resident_k += 2 * 4 * tI + 4 * F_pad            # b1 chunk (x2 buffers) + b2
    per_row_k = (
        2 * 2 * itemsize * F_pad                    # streamed f + out tiles
        + 2 * F_pad                                 # bf16 cast of f
        + 6 * tI                                    # f32 h chunk + bf16 cast of h
        + 4 * F_pad                                 # f32 accumulator scratch
        + 8 * F_pad                                 # finalize temporaries (av, residual)
    )
    per_row_k = int(per_row_k * 1.15)
    avail_k = vmem_budget_bytes - resident_k
    if avail_k < 8 * per_row_k:
        # TODO(synk): also tile the feature dim for extremely large feature_dim.
        raise ValueError(
            "feature/intermediate dims too large for the VMEM budget "
            f"({vmem_budget_bytes} bytes); reduce block_i or raise the budget.")

    tb = _pick_batch_tile(B, avail_k, per_row_k, block_b)
    B_pad = _round_up(B, tb)
    f_p = jnp.zeros((B_pad, F_pad), out_dtype).at[:B, :F].set(f)

    kernel = functools.partial(_text_projection_kernel_ktiled,
                               one_minus_alpha=one_minus_alpha)

    out_p = pl.pallas_call(
        kernel,
        out_shape=jax.ShapeDtypeStruct((B_pad, F_pad), out_dtype),
        grid=(B_pad // tb, I_pad // tI),
        in_specs=[
            pl.BlockSpec((tb, F_pad), lambda i, k: (i, 0)),   # f (constant across k)
            pl.BlockSpec((F_pad, tI), lambda i, k: (0, k)),   # W1 column chunk
            pl.BlockSpec((1, tI), lambda i, k: (0, k)),       # b1 chunk
            pl.BlockSpec((tI, F_pad), lambda i, k: (k, 0)),   # W2 row chunk
            pl.BlockSpec((1, F_pad), lambda i, k: (0, 0)),    # b2
        ],
        out_specs=pl.BlockSpec((tb, F_pad), lambda i, k: (i, 0)),
        scratch_shapes=[pltpu.VMEM((tb, F_pad), jnp.float32)],
        compiler_params=pltpu.CompilerParams(
            dimension_semantics=("parallel", "arbitrary"), **compiler_params),
    )(f_p, w1p, b1p, w2p, b2p)
    return out_p[:B, :F]


# --------------------------------------------------------------------------- #
# Test
# --------------------------------------------------------------------------- #

if __name__ == "__main__":
    alpha = 0.8

    def make_inputs(key, batch, feature_dim, intermediate_dim):
        k_f, k_w1, k_b1, k_w2, k_b2 = jax.random.split(key, 5)
        f = jax.random.normal(k_f, (batch, feature_dim), dtype=jnp.float32)
        # PyTorch nn.Linear stores (out, in); we generate directly in the
        # transposed (in, out) layout the kernel consumes.
        w1 = jax.random.normal(k_w1, (feature_dim, intermediate_dim), jnp.float32) * 0.1
        b1 = jax.random.normal(k_b1, (intermediate_dim,), jnp.float32) * 0.1
        w2 = jax.random.normal(k_w2, (intermediate_dim, feature_dim), jnp.float32) * 0.1
        b2 = jax.random.normal(k_b2, (feature_dim,), jnp.float32) * 0.1
        return f, w1, b1, w2, b2

    def mixed_ref(f, w1, b1, w2, b2, a):
        # Mirrors the kernel's bf16-MXU / f32-accumulate path (alpha folded into w2/b2).
        h = jnp.maximum(jnp.dot(f.astype(jnp.bfloat16), w1.astype(jnp.bfloat16),
                                preferred_element_type=jnp.float32) + b1, 0.0)
        av = jnp.dot(h.astype(jnp.bfloat16), (a * w2).astype(jnp.bfloat16),
                     preferred_element_type=jnp.float32) + a * b2
        return av + (1.0 - a) * f

    def f32_ref(f, w1, b1, w2, b2, a):
        return a * (jnp.maximum(f @ w1 + b1, 0.0) @ w2 + b2) + (1.0 - a) * f

    # --- resident-weights path (module-default small shapes) ---------------
    f, w1, b1, w2, b2 = make_inputs(jax.random.PRNGKey(0),
                                    batch=8, feature_dim=32, intermediate_dim=64)
    out = jax.block_until_ready(text_projection_layer(f, w1, b1, w2, b2, alpha))
    assert out.shape == (8, 32)
    assert jnp.allclose(out, mixed_ref(f, w1, b1, w2, b2, alpha), atol=2e-3, rtol=2e-3)
    assert jnp.allclose(out, f32_ref(f, w1, b1, w2, b2, alpha), atol=5e-2, rtol=5e-2)

    # --- intermediate-dim-tiled fallback path (forced, exercises k-accumulation
    #     and the >=2-step batch grid split) ---------------------------------
    f2, w12, b12, w22, b22 = make_inputs(jax.random.PRNGKey(1),
                                         batch=24, feature_dim=32, intermediate_dim=256)
    out2 = jax.block_until_ready(
        text_projection_layer(f2, w12, b12, w22, b22, alpha,
                              force_k_tiling=True, block_i=128))
    assert out2.shape == (24, 32)
    assert jnp.allclose(out2, mixed_ref(f2, w12, b12, w22, b22, alpha), atol=2e-3, rtol=2e-3)
    assert jnp.allclose(out2, f32_ref(f2, w12, b12, w22, b22, alpha), atol=5e-2, rtol=5e-2)

    print("KERNEL_OK")
</pallas_src>

<mosaic_0001>
module attributes {stable_mosaic.version = 11 : i64} {
  func.func @_text_projection_kernel(%arg0: i32, %arg1: memref<8x128xf32, #tpu.memory_space<vmem>>, %arg2: memref<128x128xbf16, #tpu.memory_space<vmem>>, %arg3: memref<1x128xf32, #tpu.memory_space<vmem>>, %arg4: memref<128x128xbf16, #tpu.memory_space<vmem>>, %arg5: memref<1x128xf32, #tpu.memory_space<vmem>>, %arg6: memref<8x128xf32, #tpu.memory_space<vmem>>) attributes {dimension_semantics = [#tpu.dimension_semantics<parallel>], iteration_bounds = array<i64: 1>, scalar_prefetch = 0 : i64, scratch_operands = 0 : i64, tpu.core_type = #tpu.core_type<tc>, window_params = [{transform_indices = @transform_0, window_bounds = array<i64: 8, 128>}, {pipeline_mode = #tpu.pipeline_mode<synchronous>, transform_indices = @transform_1, window_bounds = array<i64: 128, 128>}, {pipeline_mode = #tpu.pipeline_mode<synchronous>, transform_indices = @transform_2, window_bounds = array<i64: 1, 128>}, {pipeline_mode = #tpu.pipeline_mode<synchronous>, transform_indices = @transform_3, window_bounds = array<i64: 128, 128>}, {pipeline_mode = #tpu.pipeline_mode<synchronous>, transform_indices = @transform_4, window_bounds = array<i64: 1, 128>}, {transform_indices = @transform_5, window_bounds = array<i64: 8, 128>}]} {
    %c0 = arith.constant 0 : index
    %c0_0 = arith.constant 0 : index
    %0 = vector.load %arg1[%c0, %c0_0] : memref<8x128xf32, #tpu.memory_space<vmem>>, vector<8x128xf32>
    %1 = arith.truncf %0 : vector<8x128xf32> to vector<8x128xbf16>
    %c0_1 = arith.constant 0 : index
    %c0_2 = arith.constant 0 : index
    %2 = vector.load %arg2[%c0_1, %c0_2] : memref<128x128xbf16, #tpu.memory_space<vmem>>, vector<128x128xbf16>
    %cst = arith.constant dense<0.000000e+00> : vector<8x128xf32>
    %3 = tpu.matmul %1, %2, %cst {dimension_numbers = #tpu.dot_dimension_numbers<[1], [0], [0], [1], [0, 0, 1, 1], [], []>} : vector<8x128xbf16>, vector<128x128xbf16>, vector<8x128xf32> -> vector<8x128xf32>
    %c0_3 = arith.constant 0 : index
    %c0_4 = arith.constant 0 : index
    %4 = vector.load %arg3[%c0_3, %c0_4] : memref<1x128xf32, #tpu.memory_space<vmem>>, vector<1x128xf32>
    %5 = vector.broadcast %4 : vector<1x128xf32> to vector<8x128xf32>
    %6 = arith.addf %3, %5 : vector<8x128xf32>
    %cst_5 = arith.constant 0.000000e+00 : f32
    %7 = vector.broadcast %cst_5 : f32 to vector<8x128xf32>
    %8 = arith.maximumf %6, %7 : vector<8x128xf32>
    %9 = arith.truncf %8 : vector<8x128xf32> to vector<8x128xbf16>
    %c0_6 = arith.constant 0 : index
    %c0_7 = arith.constant 0 : index
    %10 = vector.load %arg4[%c0_6, %c0_7] : memref<128x128xbf16, #tpu.memory_space<vmem>>, vector<128x128xbf16>
    %cst_8 = arith.constant dense<0.000000e+00> : vector<8x128xf32>
    %11 = tpu.matmul %9, %10, %cst_8 {dimension_numbers = #tpu.dot_dimension_numbers<[1], [0], [0], [1], [0, 0, 1, 1], [], []>} : vector<8x128xbf16>, vector<128x128xbf16>, vector<8x128xf32> -> vector<8x128xf32>
    %c0_9 = arith.constant 0 : index
    %c0_10 = arith.constant 0 : index
    %12 = vector.load %arg5[%c0_9, %c0_10] : memref<1x128xf32, #tpu.memory_space<vmem>>, vector<1x128xf32>
    %13 = vector.broadcast %12 : vector<1x128xf32> to vector<8x128xf32>
    %14 = arith.addf %11, %13 : vector<8x128xf32>
    %c0_11 = arith.constant 0 : index
    %c0_12 = arith.constant 0 : index
    %15 = vector.load %arg1[%c0_11, %c0_12] : memref<8x128xf32, #tpu.memory_space<vmem>>, vector<8x128xf32>
    %cst_13 = arith.constant 2.000000e-01 : f32
    %16 = vector.broadcast %cst_13 : f32 to vector<8x128xf32>
    %17 = arith.mulf %16, %15 : vector<8x128xf32>
    %18 = arith.addf %14, %17 : vector<8x128xf32>
    %c0_14 = arith.constant 0 : index
    %c0_15 = arith.constant 0 : index
    %19 = vector.load %arg6[%c0_14, %c0_15] : memref<8x128xf32, #tpu.memory_space<vmem>>, vector<8x128xf32>
    tpu.vector_store %arg6[%c0_14, %c0_15], %18 {strides = array<i32>} : memref<8x128xf32, #tpu.memory_space<vmem>>, vector<8x128xf32>,
    return
  }
  func.func @transform_0(%arg0: i32) -> (i32, i32) {
    %c0_i32 = arith.constant 0 : i32
    %c0_i32_0 = arith.constant 0 : i32
    return %arg0, %c0_i32 : i32, i32
  }
  func.func @transform_1(%arg0: i32) -> (i32, i32) {
    %c0_i32 = arith.constant 0 : i32
    %c0_i32_0 = arith.constant 0 : i32
    %c0_i32_1 = arith.constant 0 : i32
    return %c0_i32, %c0_i32_0 : i32, i32
  }
  func.func @transform_2(%arg0: i32) -> (i32, i32) {
    %c0_i32 = arith.constant 0 : i32
    %c0_i32_0 = arith.constant 0 : i32
    %c0_i32_1 = arith.constant 0 : i32
    return %c0_i32, %c0_i32_0 : i32, i32
  }
  func.func @transform_3(%arg0: i32) -> (i32, i32) {
    %c0_i32 = arith.constant 0 : i32
    %c0_i32_0 = arith.constant 0 : i32
    %c0_i32_1 = arith.constant 0 : i32
    return %c0_i32, %c0_i32_0 : i32, i32
  }
  func.func @transform_4(%arg0: i32) -> (i32, i32) {
    %c0_i32 = arith.constant 0 : i32
    %c0_i32_0 = arith.constant 0 : i32
    %c0_i32_1 = arith.constant 0 : i32
    return %c0_i32, %c0_i32_0 : i32, i32
  }
  func.func @transform_5(%arg0: i32) -> (i32, i32) {
    %c0_i32 = arith.constant 0 : i32
    %c0_i32_0 = arith.constant 0 : i32
    return %arg0, %c0_i32 : i32, i32
  }
}

</mosaic_0001>

<bundles_post_ra>
// kernel: tpu_custom_call.1
= control target key start
LH: loop header
LB: loop body
LE: loop exit
PB: predicated region body
PF: predicated region fallthrough
CT: control target
= control target key end

     0   :  { %10 = vsyncpa [#allocation3], 0  ;;  %s598_s0 = inlined_call_operand.hbm [shape: f32[8,128], index: 0, kind: input, shape index: {}]   ;;  %s599_s1 = inlined_call_operand.hbm [shape: bf16[128,128], index: 1, kind: input, shape index: {}]   ;;  %s600_s2 = inlined_call_operand.vmem [shape: f32[1,128], index: 2, kind: input, shape index: {}]   ;;  %s601_s3 = inlined_call_operand.hbm [shape: bf16[128,128], index: 3, kind: input, shape index: {}]   ;;  %s602_s4 = inlined_call_operand.vmem [shape: f32[1,128], index: 4, kind: input, shape index: {}]   ;;  %s603_s5 = inlined_call_operand.hbm [shape: f32[8,128], index: 5, kind: output, shape index: {}]  }
   0x1   :  { %11 = vsyncpa [#allocation6], 0 }
   0x2   :  { %12 = vsyncpa [#allocation4], 0  ;;  %s500_s18 = smov [#allocation5]   ;;  %s406_s22 = scalar_lea.hbm %s599_s1, 1024 }
   0x3   :  { %s28_s19 = sshll.u32 %s500_s18, 4  ;;  %p407_p0 = scmp.ne.s32.totalorder %s599_s1, %s406_s22  ;;  %s29_s19 = int_to_ptr.vmem [resolvable:$true] %s28_s19 }
   0x4   :  { %p410_p1 = scmp.lt.u32.totalorder %s406_s22, %s599_s1 }
   0x6   :  { %p412_p2 = pnand %p410_p1, %p407_p0 }
   0x8   :  { %415 = shalt.err (!%p412_p2)
}
   0x9   :  { %s416_s27 = scalar_lea.vmem %s29_s19, 1024  ;;  %p421_p4 = scmp.lt.s32.totalorder %s29_s19, %s29_s19 }
   0xa   :  { %p417_p3 = scmp.ne.s32.totalorder %s29_s19, %s416_s27  ;;  %p422_p5 = scmp.lt.s32.totalorder %s416_s27, %s416_s27 }
   0xc   :  { %p423_p6 = por %p422_p5, %p421_p4 }
   0xe   :  { %p424_p7 = pnand %p423_p6, %p417_p3 }
  0x10   :  { %427 = shalt.err (!%p424_p7)
}
  0x11   :  { %s501_s28 = smov 64   ;;  %s502_s29 = smov 4  }
  0x12   :  { %34 = dma.hbm_to_vmem [thread:$0]  %s599_s1, 1024, %s29_s19, [#allocation6], %s501_s28, %s501_s28, %s502_s29  }
  0x13   :  { %s503_s7 = smov [#allocation2]   ;;  %s504_s9 = smov [#allocation7]  }
  0x14   :  { %s19_s8 = sshll.u32 %s503_s7, 4  ;;  %s42_s10 = sshll.u32 %s504_s9, 4  ;;  %s20_s8 = int_to_ptr.vmem [resolvable:$true] %s19_s8  ;;  %s43_s10 = int_to_ptr.vmem [resolvable:$true] %s42_s10 }
  0x15   :  { %s428_s13 = scalar_lea.hbm %s598_s0, 128 }
  0x16   :  { %p429_p8 = scmp.ne.s32.totalorder %s598_s0, %s428_s13  ;;  %p432_p9 = scmp.lt.u32.totalorder %s428_s13, %s598_s0 }
  0x18   :  { %p434_p10 = pnand %p432_p9, %p429_p8 }
  0x1a   :  { %437 = shalt.err (!%p434_p10)
}
  0x1b   :  { %s438_s1 = scalar_lea.vmem %s20_s8, 128  ;;  %p443_p12 = scmp.lt.s32.totalorder %s20_s8, %s20_s8 }
  0x1c   :  { %p439_p11 = scmp.ne.s32.totalorder %s20_s8, %s438_s1  ;;  %p444_p13 = scmp.lt.s32.totalorder %s438_s1, %s438_s1 }
  0x1e   :  { %p445_p0 = por %p444_p13, %p443_p12 }
  0x20   :  { %p446_p1 = pnand %p445_p0, %p439_p11 }
  0x22   :  { %449 = shalt.err (!%p446_p1)
}
  0x23   :  { %22 = dma.hbm_to_vmem [thread:$0]  %s598_s0, 128, %s20_s8, [#allocation3]  }
  0x24   :  { %s450_s22 = scalar_lea.hbm %s601_s3, 1024 }
  0x25   :  { %p451_p2 = scmp.ne.s32.totalorder %s601_s3, %s450_s22  ;;  %p454_p3 = scmp.lt.u32.totalorder %s450_s22, %s601_s3 }
  0x27   :  { %p456_p4 = pnand %p454_p3, %p451_p2 }
  0x29   :  { %459 = shalt.err (!%p456_p4)
}
  0x2a   :  { %s460_s27 = scalar_lea.vmem %s43_s10, 1024  ;;  %p465_p6 = scmp.lt.s32.totalorder %s43_s10, %s43_s10 }
  0x2b   :  { %p461_p5 = scmp.ne.s32.totalorder %s43_s10, %s460_s27  ;;  %p466_p7 = scmp.lt.s32.totalorder %s460_s27, %s460_s27 }
  0x2d   :  { %p467_p8 = por %p466_p7, %p465_p6 }
  0x2f   :  { %p468_p9 = pnand %p467_p8, %p461_p5 }
  0x31   :  { %471 = shalt.err (!%p468_p9)
}
  0x32   :  { %48 = dma.hbm_to_vmem [thread:$0]  %s601_s3, 1024, %s43_s10, [#allocation6], %s501_s28, %s501_s28, %s502_s29  }
  0x33   :  { %494 = dma.done.wait [#allocation3], 128  }
  0x34   :  { %495 = vsyncadd [#allocation3], 4294967168 }
  0x35   :  { %496 = dma.done.wait [#allocation6], 2048  }
  0x36   :  { %497 = vsyncadd [#allocation6], 4294965248  ;;  %v505_v0 = vmov 0.0   ;;  %vm506_vm0 = vmmov 0   ;;  %v390_v1 = vld [vmem:[#allocation5] sm:$0xff]   ;;  %v391_v2 = vld [vmem:[#allocation5 + $0x8] sm:$0xff]  }
  0x37   :  { %342 = vmatprep.subr.bf16.mxu0 %v505_v0  ;;  %358 = vmatprep.mubr.msk.bf16.mxu0 %vm506_vm0, %v505_v0  ;;  %v392_v3 = vld [vmem:[#allocation5 + $0x10] sm:$0xff]   ;;  %v398_v4 = vld [vmem:[#allocation7] sm:$0xff]   ;;  %v393_v5 = vld [vmem:[#allocation5 + $0x18] sm:$0xff]   ;;  %s507_s7 = smov [#allocation8]  }
  0x38   :  { %362 = vmatprep.subr.bf16.mxu1 %v505_v0  ;;  %378 = vmatprep.mubr.msk.bf16.mxu1 %vm506_vm0, %v505_v0  ;;  %v399_v6 = vld [vmem:[#allocation7 + $0x8] sm:$0xff]   ;;  %v394_v7 = vld [vmem:[#allocation5 + $0x20] sm:$0xff]   ;;  %v400_v8 = vld [vmem:[#allocation7 + $0x10] sm:$0xff]   ;;  %s296_s8 = sshll.u32 %s507_s7, 4  ;;  %s297_s8 = int_to_ptr.vmem [resolvable:$true] %s296_s8 }
  0x39   :  { %343 = vmatpush3.bf16.msra.mxu0 %v390_v1  ;;  %363 = vmatpush3.bf16.msra.mxu1 %v398_v4  ;;  %v395_v9 = vld [vmem:[#allocation5 + $0x28] sm:$0xff]   ;;  %v401_v10 = vld [vmem:[#allocation7 + $0x18] sm:$0xff]   ;;  %v396_v11 = vld [vmem:[#allocation5 + $0x30] sm:$0xff]   ;;  %p477_p11 = scmp.lt.s32.totalorder %s297_s8, %s297_s8 }
  0x3a   :  { %344 = vmatprep.subr.bf16.mxu0 %v505_v0  ;;  %364 = vmatprep.subr.bf16.mxu1 %v505_v0  ;;  %v402_v12 = vld [vmem:[#allocation7 + $0x20] sm:$0xff]   ;;  %v397_v13 = vld [vmem:[#allocation5 + $0x38] sm:$0xff]   ;;  %v403_v15 = vld [vmem:[#allocation7 + $0x28] sm:$0xff]  }
  0x3b   :  { %v61_v14 = vld [vmem:[#allocation2] sm:$0xff]  ;;  %v404_v17 = vld [vmem:[#allocation7 + $0x30] sm:$0xff]  }
  0x3c   :  { %v62_v16 = vpack.c.bf16 %v61_v14, %v61_v14  ;;  %v405_v18 = vld [vmem:[#allocation7 + $0x38] sm:$0xff]   ;;  %v287_v28 = vmul.f32 0.2, %v61_v14 }
  0x3d   :  { %345 = vmatpush3.bf16.msra.mxu0 %v391_v2  ;;  %365 = vmatpush3.bf16.msra.mxu1 %v399_v6  ;;  %v306_v19 = vld [vmem:[%s600_s2] ss:$0 sm:$0xff]  ;;  %s472_s2 = scalar_lea.vmem %s297_s8, 128 }
  0x3e   :  { %346 = vmatprep.subr.bf16.mxu0 %v505_v0  ;;  %366 = vmatprep.subr.bf16.mxu1 %v505_v0  ;;  %v315_v27 = vld [vmem:[%s602_s4] ss:$0 sm:$0xff]  ;;  %p473_p10 = scmp.ne.s32.totalorder %s297_s8, %s472_s2  ;;  %p478_p12 = scmp.lt.s32.totalorder %s472_s2, %s472_s2 }
  0x40   :  { %p479_p13 = por %p478_p12, %p477_p11 }
  0x41   :  { %347 = vmatpush3.bf16.msra.mxu0 %v392_v3  ;;  %367 = vmatpush3.bf16.msra.mxu1 %v400_v8 }
  0x42   :  { %348 = vmatprep.subr.bf16.mxu0 %v505_v0  ;;  %368 = vmatprep.subr.bf16.mxu1 %v505_v0  ;;  %p480_p0 = pnand %p479_p13, %p473_p10 }
  0x45   :  { %349 = vmatpush3.bf16.msra.mxu0 %v393_v5  ;;  %369 = vmatpush3.bf16.msra.mxu1 %v401_v10 }
  0x46   :  { %350 = vmatprep.subr.bf16.mxu0 %v505_v0  ;;  %370 = vmatprep.subr.bf16.mxu1 %v505_v0 }
  0x49   :  { %351 = vmatpush3.bf16.msra.mxu0 %v394_v7  ;;  %371 = vmatpush3.bf16.msra.mxu1 %v402_v12 }
  0x4a   :  { %352 = vmatprep.subr.bf16.mxu0 %v505_v0  ;;  %372 = vmatprep.subr.bf16.mxu1 %v505_v0 }
  0x4d   :  { %353 = vmatpush3.bf16.msra.mxu0 %v395_v9  ;;  %373 = vmatpush3.bf16.msra.mxu1 %v403_v15 }
  0x4e   :  { %354 = vmatprep.subr.bf16.mxu0 %v505_v0  ;;  %374 = vmatprep.subr.bf16.mxu1 %v505_v0 }
  0x51   :  { %355 = vmatpush3.bf16.msra.mxu0 %v396_v11  ;;  %375 = vmatpush3.bf16.msra.mxu1 %v404_v17 }
  0x52   :  { %356 = vmatprep.subr.bf16.mxu0 %v505_v0  ;;  %376 = vmatprep.subr.bf16.mxu1 %v505_v0 }
  0x55   :  { %357 = vmatpush3.bf16.msra.mxu0 %v397_v13  ;;  %377 = vmatpush3.bf16.msra.mxu1 %v405_v18 }
  0x58   :  { %359 = vmatmul.mubr.bf16.vlgmr.msra.gmra.mrb[0].mxu0 %v62_v16 }
 0x12b   :  { %v168_v20 = vpop.f32.mrb[0].mxu0 }
 0x12c   :  { %v169_v21 = vadd.f32 %v306_v19, %v168_v20  ;;  %v360_v22 = vpop.f32.mrb[1].mxu0 }
 0x12d   :  { %v171_v23 = vpop.f32.mrb[2].mxu0 }
 0x12e   :  { %v174_v24 = vmax.f32 %v169_v21, 0.0  ;;  %v361_v25 = vpop.f32.mrb[3].mxu0 }
 0x130   :  { %v175_v26 = vpack.c.bf16 %v174_v24, %v174_v24 }
 0x132   :  { %379 = vmatmul.mubr.bf16.vlgmr.msra.gmra.mrb[0].mxu1 %v175_v26 }
 0x205   :  { %v281_v29 = vpop.f32.mrb[0].mxu1 }
 0x206   :  { %v282_v30 = vadd.f32 %v315_v27, %v281_v29  ;;  %v380_v31 = vpop.f32.mrb[1].mxu1 }
 0x207   :  { %v284_v32 = vpop.f32.mrb[2].mxu1 }
 0x208   :  { %v288_v33 = vadd.f32 %v287_v28, %v282_v30  ;;  %v381_v34 = vpop.f32.mrb[3].mxu1 }
 0x20a   :  { %289 = vst [vmem:[#allocation8] sm:$0xff] %v288_v33 }
 0x20b   :  { %483 = shalt.err (!%p480_p0)
}
 0x20c   :  { %s484_s10 = scalar_lea.hbm %s603_s5, 128 }
 0x20d   :  { %p485_p1 = scmp.ne.s32.totalorder %s603_s5, %s484_s10  ;;  %p488_p2 = scmp.lt.u32.totalorder %s484_s10, %s603_s5 }
 0x20f   :  { %p490_p3 = pnand %p488_p2, %p485_p1 }
 0x211   :  { %493 = shalt.err (!%p490_p3)
}
 0x212   :  { %299 = dma.vmem_to_hbm [thread:$0]  %s297_s8, 128, %s603_s5, [#allocation4]  }
 0x213   :  { %498 = dma.done.wait [#allocation4], 128  }
 0x214   :  { %499 = vsyncadd [#allocation4], 4294967168 }
 0x215   :  { %303 = vsyncpa [#allocation3], 1 }
 0x216   :  { %304 = vsyncpa [#allocation6], 1 }
 0x217   :  { %305 = vsyncpa [#allocation4], 1 }

</bundles_post_ra>
